<compile_context>
chip_gen: v5e
topology: v5e:2x2
jax: 0.10.0
libtpu: 0.0.40
codegen_flags: <defaults>
</compile_context>

<pallas_src>
import jax
import jax.numpy as jnp
from jax.experimental import pallas as pl
from jax.experimental.pallas import tpu as pltpu


def _round_up(n, m):
    return ((n + m - 1) // m) * m


def _cdiv(a, b):
    return -(-a // b)


def _fair_lora_kernel(x_ref, at_ref, bt_ref, o_ref):
    # x_ref : (TB, in_features)   streamed batch tile, native x dtype
    # at_ref: (in_features, r)    VMEM-resident across the grid (single-buffered)
    # bt_ref: (r, TN)             (S @ B.T) * alpha/r tile, lane-dense
    # o_ref : (TB, TN)            lane-dense output tile
    x = x_ref[...].astype(at_ref.dtype)            # cast in VMEM (VPU), not in HBM
    xa = jnp.dot(x, at_ref[...], preferred_element_type=jnp.float32)
    out = jnp.dot(xa.astype(bt_ref.dtype), bt_ref[...],
                  preferred_element_type=jnp.float32)
    o_ref[...] = out.astype(o_ref.dtype)


def _vmem_params():
    """Generation-aware (budget, vmem_limit cap, max batch tile)."""
    try:
        cap = int(pltpu.get_tpu_info().vmem_capacity_bytes)
    except Exception:
        cap = 64 * 1024 * 1024
    if cap >= 100 * 1024 * 1024:          # v5e / v6e: 128 MiB physical VMEM
        return 88 * 1024 * 1024, 96 * 1024 * 1024, 1024
    return 40 * 1024 * 1024, 48 * 1024 * 1024, 512   # v7x: 64 MiB physical


def _weight_spec(shape, index_map, *, single_buffer):
    """Constant-index weight blocks don't need double buffering."""
    if single_buffer:
        try:
            return pl.BlockSpec(shape, index_map, pipeline_mode=pl.Buffered(1))
        except TypeError:                 # older BlockSpec without pipeline_mode
            pass
    return pl.BlockSpec(shape, index_map)


# Cached weight prep (keyed on array identity: valid while the caller keeps the
# same parameter arrays alive, i.e. the normal inference/training-step case).
_PREP_CACHE = {}


def prepare_fair_lora_weights(lora_A, lora_B, S, *, alpha=16.0, r=8,
                              compute_dtype=jnp.float32, lane_multiple=128):
    """Hoisted, cacheable prep for ONE demographic: transpose + fold S, alpha/r."""
    key = (id(lora_A), id(lora_B), id(S), float(alpha), int(r),
           jnp.dtype(compute_dtype).name, int(lane_multiple))
    hit = _PREP_CACHE.get(key)
    if hit is not None:
        return hit
    out_features = lora_B.shape[0]
    out_p = _round_up(out_features, lane_multiple)
    At = lora_A.T.astype(compute_dtype)                          # (in_features, r)
    w = (S.astype(jnp.float32) @ lora_B.T.astype(jnp.float32)) * (float(alpha) / float(r))
    if out_p != out_features:
        w = jnp.pad(w, ((0, 0), (0, out_p - out_features)))      # lane-dense pad
    prep = (At, w.astype(compute_dtype), out_features)
    _PREP_CACHE[key] = prep
    return prep


def fair_lora_forward(x, At, Bt_eff, out_features, *, tn_max=2048):
    """y = (x @ At) @ Bt_eff   (S and alpha/r already folded into Bt_eff)."""
    orig_shape = x.shape
    in_features = orig_shape[-1]
    x2 = x.reshape(-1, in_features)
    batch = x2.shape[0]
    r = At.shape[1]
    out_p0 = Bt_eff.shape[1]

    x_bytes = jnp.dtype(x.dtype).itemsize
    w_bytes = jnp.dtype(At.dtype).itemsize
    sub = 16 if x_bytes == 2 else 8          # bf16 sublane tile is (16, 128)

    vmem_budget, vmem_cap, tb_max = _vmem_params()

    # ---- N (out-feature) tiling: keeps the output block inside VMEM for big
    # out_features and adds grid points for megacore sharding. ----
    nn = _cdiv(out_p0, tn_max)
    tn = _round_up(_cdiv(out_p0, nn), 128)
    out_p = nn * tn
    if out_p != out_p0:                      # tiny (r rows) extra pad, rarely hit
        Bt_eff = jnp.pad(Bt_eff, ((0, 0), (0, out_p - out_p0)))

    # ---- batch tiling: largest tile fitting VMEM, then balanced so the last
    # tile is nearly full (pads at most ~sub rows per tile, not tb-1). ----
    batch_sub = _round_up(batch, sub)

    def footprint(tb):
        w = in_features * r * w_bytes                          # At (single buffer)
        w += (1 if nn == 1 else 2) * r * tn * w_bytes          # Bt_eff tile
        io = 2 * tb * in_features * x_bytes                    # double-buffered x
        io += 2 * tb * tn * x_bytes                            # double-buffered out
        return w + io + (1 << 20)                              # ~1 MiB slack

    tb = min(tb_max, batch_sub)
    while tb > sub and footprint(tb) > vmem_budget:
        tb = max(sub, _round_up(tb // 2, sub))
    nb = _cdiv(batch_sub, tb)
    if nb * nn < 2 and batch_sub >= 2 * sub:   # >=2 grid steps => both v7x cores busy
        nb = 2
    tb = _round_up(_cdiv(batch_sub, nb), sub)
    batch_p = nb * tb

    if batch_p != batch:                       # minimal, only-when-needed pad
        x2 = jnp.pad(x2, ((0, batch_p - batch), (0, 0)))

    vmem_limit = int(min(max(footprint(tb) + (2 << 20), 8 << 20), vmem_cap))

    flops = 2 * batch * r * (in_features + out_features)
    bytes_accessed = (batch * in_features * x_bytes
                      + batch * out_features * x_bytes
                      + (in_features * r + r * out_p) * w_bytes)

    out = pl.pallas_call(
        _fair_lora_kernel,
        out_shape=jax.ShapeDtypeStruct((batch_p, out_p), x.dtype),
        grid=(nb, nn),                                   # j innermost -> x block reused
        in_specs=[
            pl.BlockSpec((tb, in_features), lambda i, j: (i, 0)),       # streamed x
            _weight_spec((in_features, r), lambda i, j: (0, 0),
                         single_buffer=True),                           # resident A.T
            _weight_spec((r, tn), lambda i, j: (0, j),
                         single_buffer=(nn == 1)),                      # Bt_eff tile
        ],
        out_specs=pl.BlockSpec((tb, tn), lambda i, j: (i, j)),
        compiler_params=pltpu.CompilerParams(
            dimension_semantics=("parallel", "parallel"),
            vmem_limit_bytes=vmem_limit,
        ),
        cost_estimate=pl.CostEstimate(flops=flops, transcendentals=0,
                                      bytes_accessed=bytes_accessed),
    )(x2, At, Bt_eff)

    if batch_p != batch or out_p != out_features:        # slice only if padded
        out = out[:batch, :out_features]
    return out.reshape(*orig_shape[:-1], out_features)


def fair_lora_apply(x, lora_A, lora_B, scaling_matrices, demographic="default", *,
                    alpha=16.0, r=8, compute_dtype=None):
    """Matches FairLoRALayer.forward (dropout p=0.0 -> identity)."""
    if demographic not in scaling_matrices:
        demographic = "default"
    if demographic in scaling_matrices:
        S = scaling_matrices[demographic]
    else:                                   # graceful fallback if no 'default' key
        S = jnp.eye(r, dtype=jnp.float32)
    if compute_dtype is None:
        compute_dtype = x.dtype
    At, Bt_eff, out_features = prepare_fair_lora_weights(
        lora_A, lora_B, S, alpha=alpha, r=r, compute_dtype=compute_dtype)
    return fair_lora_forward(x, At, Bt_eff, out_features)


if __name__ == "__main__":
    batch, in_features, out_features, r, alpha = 8, 32, 32, 8, 16.0

    key = jax.random.PRNGKey(0)
    kx, ka, kb, ks = jax.random.split(key, 4)

    # lora_A ~ kaiming_uniform(a=sqrt(5)) => U(-1/sqrt(fan_in), 1/sqrt(fan_in)).
    bound_a = 1.0 / jnp.sqrt(float(in_features))
    lora_A = jax.random.uniform(ka, (r, in_features), jnp.float32,
                                minval=-bound_a, maxval=bound_a)
    # NOTE: the module zero-inits lora_B (output would be all zeros); use small
    # deterministic random values so the kernel path is actually exercised.
    lora_B = 0.02 * jax.random.normal(kb, (out_features, r), jnp.float32)
    scaling_matrices = {
        "default": jnp.eye(r, dtype=jnp.float32),
        "group_a": jnp.eye(r, dtype=jnp.float32)
        + 0.01 * jax.random.normal(ks, (r, r), jnp.float32),
    }
    x = jax.random.normal(kx, (batch, in_features), jnp.float32)
    scaling = alpha / r

    def reference(xv, amat, bmat, group):
        return ((xv @ amat.T) @ scaling_matrices[group]) @ bmat.T * scaling

    # f32 path, tight tolerance.
    out = jax.block_until_ready(
        fair_lora_apply(x, lora_A, lora_B, scaling_matrices, "group_a",
                        alpha=alpha, r=r))
    assert out.shape == (batch, out_features)
    assert jnp.allclose(out, reference(x, lora_A, lora_B, "group_a"),
                        atol=1e-5, rtol=1e-5)

    # Unknown demographic falls back to "default".
    out_def = jax.block_until_ready(
        fair_lora_apply(x, lora_A, lora_B, scaling_matrices, "unknown",
                        alpha=alpha, r=r))
    assert jnp.allclose(out_def, reference(x, lora_A, lora_B, "default"),
                        atol=1e-5, rtol=1e-5)

    # 3-D input + odd shapes: exercises batch padding (135 rows, not a multiple
    # of 8), the balanced multi-tile batch grid, and lane padding (out=40).
    x3 = jax.random.normal(jax.random.PRNGKey(1), (3, 45, in_features), jnp.float32)
    lora_B2 = 0.02 * jax.random.normal(jax.random.PRNGKey(2), (40, r), jnp.float32)
    out3 = jax.block_until_ready(
        fair_lora_apply(x3, lora_A, lora_B2, scaling_matrices, "group_a",
                        alpha=alpha, r=r))
    assert out3.shape == (3, 45, 40)
    ref3 = reference(x3.reshape(-1, in_features), lora_A, lora_B2,
                     "group_a").reshape(3, 45, 40)
    assert jnp.allclose(out3, ref3, atol=1e-5, rtol=1e-5)

    # bf16 compute path (x stays f32 in HBM, cast happens inside the kernel),
    # f32 accumulation; looser tolerance.
    out_bf16 = jax.block_until_ready(
        fair_lora_apply(x, lora_A, lora_B, scaling_matrices, "group_a",
                        alpha=alpha, r=r, compute_dtype=jnp.bfloat16))
    assert out_bf16.dtype == x.dtype
    assert jnp.allclose(out_bf16, reference(x, lora_A, lora_B, "group_a"),
                        atol=5e-3, rtol=5e-2)

    # Cached prep: second call with identical params reuses the folded weights.
    _ = jax.block_until_ready(
        fair_lora_apply(x, lora_A, lora_B, scaling_matrices, "group_a",
                        alpha=alpha, r=r))

    print("KERNEL_OK")
</pallas_src>

<mosaic_0001>
module attributes {stable_mosaic.version = 11 : i64} {
  func.func @_fair_lora_kernel(%arg0: i32, %arg1: i32, %arg2: memref<8x32xf32, #tpu.memory_space<vmem>>, %arg3: memref<32x8xf32, #tpu.memory_space<vmem>>, %arg4: memref<8x128xf32, #tpu.memory_space<vmem>>, %arg5: memref<8x128xf32, #tpu.memory_space<vmem>>) attributes {dimension_semantics = [#tpu.dimension_semantics<parallel>, #tpu.dimension_semantics<parallel>], iteration_bounds = array<i64: 1, 1>, scalar_prefetch = 0 : i64, scratch_operands = 0 : i64, tpu.core_type = #tpu.core_type<tc>, window_params = [{transform_indices = @transform_0, window_bounds = array<i64: 8, 32>}, {pipeline_mode = #tpu.pipeline_mode<synchronous>, transform_indices = @transform_1, window_bounds = array<i64: 32, 8>}, {pipeline_mode = #tpu.pipeline_mode<synchronous>, transform_indices = @transform_2, window_bounds = array<i64: 8, 128>}, {transform_indices = @transform_3, window_bounds = array<i64: 8, 128>}]} {
    %c0 = arith.constant 0 : index
    %c0_0 = arith.constant 0 : index
    %0 = vector.load %arg2[%c0, %c0_0] : memref<8x32xf32, #tpu.memory_space<vmem>>, vector<8x32xf32>
    %c0_1 = arith.constant 0 : index
    %c0_2 = arith.constant 0 : index
    %1 = vector.load %arg3[%c0_1, %c0_2] : memref<32x8xf32, #tpu.memory_space<vmem>>, vector<32x8xf32>
    %cst = arith.constant dense<0.000000e+00> : vector<8x8xf32>
    %2 = tpu.matmul %0, %1, %cst {dimension_numbers = #tpu.dot_dimension_numbers<[1], [0], [0], [1], [0, 0, 1, 1], [], []>} : vector<8x32xf32>, vector<32x8xf32>, vector<8x8xf32> -> vector<8x8xf32>
    %c0_3 = arith.constant 0 : index
    %c0_4 = arith.constant 0 : index
    %3 = vector.load %arg4[%c0_3, %c0_4] : memref<8x128xf32, #tpu.memory_space<vmem>>, vector<8x128xf32>
    %cst_5 = arith.constant dense<0.000000e+00> : vector<8x128xf32>
    %4 = tpu.matmul %2, %3, %cst_5 {dimension_numbers = #tpu.dot_dimension_numbers<[1], [0], [0], [1], [0, 0, 1, 1], [], []>} : vector<8x8xf32>, vector<8x128xf32>, vector<8x128xf32> -> vector<8x128xf32>
    %c0_6 = arith.constant 0 : index
    %c0_7 = arith.constant 0 : index
    %5 = vector.load %arg5[%c0_6, %c0_7] : memref<8x128xf32, #tpu.memory_space<vmem>>, vector<8x128xf32>
    tpu.vector_store %arg5[%c0_6, %c0_7], %4 {strides = array<i32>} : memref<8x128xf32, #tpu.memory_space<vmem>>, vector<8x128xf32>,
    return
  }
  func.func @transform_0(%arg0: i32, %arg1: i32) -> (i32, i32) {
    %c0_i32 = arith.constant 0 : i32
    %c0_i32_0 = arith.constant 0 : i32
    return %arg0, %c0_i32 : i32, i32
  }
  func.func @transform_1(%arg0: i32, %arg1: i32) -> (i32, i32) {
    %c0_i32 = arith.constant 0 : i32
    %c0_i32_0 = arith.constant 0 : i32
    %c0_i32_1 = arith.constant 0 : i32
    return %c0_i32, %c0_i32_0 : i32, i32
  }
  func.func @transform_2(%arg0: i32, %arg1: i32) -> (i32, i32) {
    %c0_i32 = arith.constant 0 : i32
    %c0_i32_0 = arith.constant 0 : i32
    return %c0_i32, %arg1 : i32, i32
  }
  func.func @transform_3(%arg0: i32, %arg1: i32) -> (i32, i32) {
    %c0_i32 = arith.constant 0 : i32
    return %arg0, %arg1 : i32, i32
  }
}

</mosaic_0001>

<bundles_post_ra>
// kernel: tpu_custom_call.1
= control target key start
LH: loop header
LB: loop body
LE: loop exit
PB: predicated region body
PF: predicated region fallthrough
CT: control target
= control target key end

     0   :  { %s157_s0 = inlined_call_operand.vmem [shape: f32[8,32], index: 0, kind: input, shape index: {}]   ;;  %s158_s1 = inlined_call_operand.vmem [shape: f32[32,8], index: 1, kind: input, shape index: {}]   ;;  %s159_s2 = inlined_call_operand.vmem [shape: f32[8,128], index: 2, kind: input, shape index: {}]   ;;  %s160_s3 = inlined_call_operand.hbm [shape: f32[8,128], index: 3, kind: output, shape index: {}]  }
   0x1   :  { %v19_v0 = vld [vmem:[%s158_s1 + $0x18] sm:$0xff]  ;;  %v18_v1 = vld [vmem:[%s158_s1 + $0x10] sm:$0xff] }
   0x2   :  { %36 = vmatpush.msra.mxu0 %v19_v0 }
   0x3   :  { %8 = vsyncpa [#allocation3], 0  ;;  %v17_v2 = vld [vmem:[%s158_s1 + $0x8] sm:$0xff]  ;;  %v16_v3 = vld [vmem:[%s158_s1] sm:$0xff]  ;;  %vm20_vm0 = vcmask 261120   ;;  %vm45_vm1 = vcmask 64512  }
   0x4   :  { %37 = vmatpush.msra.mxu0 %v18_v1  ;;  %v15_v4 = vld [vmem:[%s157_s0] sm:$0xff]  ;;  %s115_s24 = smov [#allocation2]   ;;  %s77_s27 = sshll.u32 %s160_s3, 4  ;;  %s78_s27 = int_to_ptr.hbm [resolvable:$true] %s77_s27 }
   0x5   :  { %v44_v5 = vld [vmem:[%s159_s2] sm:$0xff]  ;;  %s75_s25 = sshll.u32 %s115_s24, 4  ;;  %s76_s25 = int_to_ptr.vmem [resolvable:$true] %s75_s25 }
   0x6   :  { %38 = vmatpush.msra.mxu0 %v17_v2  ;;  %64 = vmatpush.msra.mxu1 %v44_v5 }
   0x8   :  { %39 = vmatpush.msra.mxu0 %v16_v3 }
   0x9   :  { %86 = vmatmul.msk.f32.vlgmr.msra.gmra.mxu0 %vm20_vm0, %v15_v4 }
  0x86   :  { %v41_v6 = vpop.f32.mrf.mxu0 }
  0x87   :  { %87 = vmatmul.msk.f32.vlgmr.msra.gmra.mxu1 %vm45_vm1, %v41_v6 }
 0x104   :  { %v66_v7 = vpop.f32.mrf.mxu1 }
 0x105   :  { %69 = vst [vmem:[#allocation2] sm:$0xff] %v66_v7 }
 0x106   :  { %80 = dma.vmem_to_hbm [thread:$0]  %s76_s25, 128, %s78_s27, [#allocation3]  }
 0x107   :  { %113 = dma.done.wait [#allocation3], 128  }
 0x108   :  { %114 = vsyncadd [#allocation3], 4294967168 }
 0x109   :  { %85 = vsyncpa [#allocation3], 1 }

</bundles_post_ra>
